<compile_context>
chip_gen: v6e
topology: v6e:2x2x1
jax: 0.10.0
libtpu: 0.0.40
codegen_flags: <defaults>
</compile_context>

<pallas_src>
import functools

import jax
import jax.numpy as jnp
from jax import lax
from jax.experimental import pallas as pl
from jax.experimental.pallas import tpu as pltpu


def _simclr_kernel(z1r_ref, z2r_ref, z1c_ref, z2c_ref,   # inputs
                   l1_ref, l2_ref,                        # outputs (per-row losses)
                   d1_acc, d2_acc,                        # VMEM scratch accumulators
                   *, tau):
    c = pl.program_id(1)
    num_c = pl.num_programs(1)
    inv_tau = jnp.float32(1.0 / tau)

    @pl.when(c == 0)
    def _():
        d1_acc[...] = jnp.zeros_like(d1_acc)
        d2_acc[...] = jnp.zeros_like(d2_acc)

    a1 = z1r_ref[...]        # (TR, D) rows from z1
    a2 = z2r_ref[...]        # (TR, D) rows from z2
    b1 = z1c_ref[...]        # (TC, D) cols from z1
    b2 = z2c_ref[...]        # (TC, D) cols from z2

    # Contract over the feature dim of both operands (trans-B, no explicit .T).
    dn = (((1,), (1,)), ((), ()))
    s11 = jnp.exp(lax.dot_general(a1, b1, dn, preferred_element_type=jnp.float32) * inv_tau)
    s12 = jnp.exp(lax.dot_general(a1, b2, dn, preferred_element_type=jnp.float32) * inv_tau)
    s21 = jnp.exp(lax.dot_general(a2, b1, dn, preferred_element_type=jnp.float32) * inv_tau)
    s22 = jnp.exp(lax.dot_general(a2, b2, dn, preferred_element_type=jnp.float32) * inv_tau)

    # Running denominator (includes the self term for now; subtracted at the end).
    d1_acc[...] += (jnp.sum(s11, axis=-1, keepdims=True)
                    + jnp.sum(s12, axis=-1, keepdims=True))
    d2_acc[...] += (jnp.sum(s21, axis=-1, keepdims=True)
                    + jnp.sum(s22, axis=-1, keepdims=True))

    @pl.when(c == num_c - 1)
    def _():
        a1f = a1.astype(jnp.float32)
        a2f = a2.astype(jnp.float32)
        self1 = jnp.exp(jnp.sum(a1f * a1f, axis=-1, keepdims=True) * inv_tau)  # (TR,1)
        self2 = jnp.exp(jnp.sum(a2f * a2f, axis=-1, keepdims=True) * inv_tau)
        pos = jnp.sum(a1f * a2f, axis=-1, keepdims=True) * inv_tau             # (TR,1)

        loss1 = jnp.log(d1_acc[...] - self1) - pos   # rows i      (z1 half)
        loss2 = jnp.log(d2_acc[...] - self2) - pos   # rows i + B  (z2 half)

        tr = loss1.shape[0]
        l1_ref[...] = loss1.reshape(1, 1, tr)
        l2_ref[...] = loss2.reshape(1, 1, tr)


def _pick_tile(n, target):
    """Largest divisor of n that is <= target (n itself if n <= target)."""
    if n <= target:
        return n
    for t in range(target, 0, -1):
        if n % t == 0:
            return t
    return n


def simclr_loss(z1, z2, tau=0.5, *, row_tile=None, col_tile=None):
    """Pallas implementation of SimCLRLoss.forward(z1, z2)."""
    B, D = z1.shape
    assert z2.shape == (B, D)

    # 256-multiples feed the v6e/v7x 256x256 MXU; also valid (2x128) on v5e.
    tr = row_tile if row_tile is not None else _pick_tile(B, 256)
    tc = col_tile if col_tile is not None else _pick_tile(B, 512)
    assert B % tr == 0 and B % tc == 0
    num_r = B // tr
    num_c = B // tc

    n = 2 * B
    itemsize = jnp.dtype(z1.dtype).itemsize
    cost = pl.CostEstimate(
        flops=2 * n * n * D,
        transcendentals=n * n + 2 * n,
        bytes_accessed=2 * B * D * itemsize * (1 + num_r) + 2 * n * 4,
    )

    kernel = functools.partial(_simclr_kernel, tau=float(tau))
    l1, l2 = pl.pallas_call(
        kernel,
        out_shape=(
            jax.ShapeDtypeStruct((num_r, 1, tr), jnp.float32),
            jax.ShapeDtypeStruct((num_r, 1, tr), jnp.float32),
        ),
        grid_spec=pltpu.PrefetchScalarGridSpec(
            num_scalar_prefetch=0,
            grid=(num_r, num_c),
            in_specs=[
                pl.BlockSpec((tr, D), lambda r, c: (r, 0)),   # z1 row block (LHS)
                pl.BlockSpec((tr, D), lambda r, c: (r, 0)),   # z2 row block (LHS)
                pl.BlockSpec((tc, D), lambda r, c: (c, 0)),   # z1 col block (RHS)
                pl.BlockSpec((tc, D), lambda r, c: (c, 0)),   # z2 col block (RHS)
            ],
            out_specs=[
                pl.BlockSpec((1, 1, tr), lambda r, c: (r, 0, 0)),
                pl.BlockSpec((1, 1, tr), lambda r, c: (r, 0, 0)),
            ],
            scratch_shapes=[
                pltpu.VMEM((tr, 1), jnp.float32),   # running denom, z1 half
                pltpu.VMEM((tr, 1), jnp.float32),   # running denom, z2 half
            ],
        ),
        compiler_params=pltpu.CompilerParams(
            dimension_semantics=("parallel", "arbitrary"),
            vmem_limit_bytes=32 * 1024 * 1024,
        ),
        cost_estimate=cost,
    )(z1, z2, z1, z2)

    # Tiny finalization in the wrapper: mean over all 2B per-row losses.
    return (jnp.sum(l1) + jnp.sum(l2)) / (2.0 * B)


def _simclr_loss_ref(z1, z2, tau=0.5):
    """Pure-JAX reference mirroring the PyTorch semantics."""
    B = z1.shape[0]
    out = jnp.concatenate([z1, z2], axis=0)
    sim = jnp.exp(out @ out.T / tau)
    nn_ = 2 * B
    denom = jnp.sum(sim * (1.0 - jnp.eye(nn_)), axis=-1)
    pos = jnp.exp(jnp.sum(z1 * z2, axis=-1) / tau)
    pos = jnp.concatenate([pos, pos], axis=0)
    return jnp.mean(-jnp.log(pos / denom))


if __name__ == "__main__":
    key = jax.random.PRNGKey(0)
    k1, k2 = jax.random.split(key)
    B, D = 16, 32
    z1 = jax.random.normal(k1, (B, D), dtype=jnp.float32)
    z2 = jax.random.normal(k2, (B, D), dtype=jnp.float32)
    # SimCLR projections are L2-normalized.
    z1 = z1 / jnp.linalg.norm(z1, axis=-1, keepdims=True)
    z2 = z2 / jnp.linalg.norm(z2, axis=-1, keepdims=True)

    ref = _simclr_loss_ref(z1, z2, tau=0.5)

    # Single-tile path (grid 1x1).
    loss_single = simclr_loss(z1, z2, tau=0.5)
    jax.block_until_ready(loss_single)
    assert jnp.allclose(loss_single, ref, rtol=1e-5, atol=1e-5), (loss_single, ref)

    # Multi-tile path exercising the streaming denominator (grid 2x2).
    loss_tiled = simclr_loss(z1, z2, tau=0.5, row_tile=8, col_tile=8)
    jax.block_until_ready(loss_tiled)
    assert jnp.allclose(loss_tiled, ref, rtol=1e-5, atol=1e-5), (loss_tiled, ref)

    print("KERNEL_OK")
</pallas_src>

<mosaic_0001>
module attributes {stable_mosaic.version = 11 : i64} {
  func.func @_simclr_kernel(%arg0: i32, %arg1: i32, %arg2: memref<16x32xf32, #tpu.memory_space<vmem>>, %arg3: memref<16x32xf32, #tpu.memory_space<vmem>>, %arg4: memref<16x32xf32, #tpu.memory_space<vmem>>, %arg5: memref<16x32xf32, #tpu.memory_space<vmem>>, %arg6: memref<1x1x16xf32, #tpu.memory_space<vmem>>, %arg7: memref<1x1x16xf32, #tpu.memory_space<vmem>>, %arg8: memref<16x1xf32, #tpu.memory_space<vmem>>, %arg9: memref<16x1xf32, #tpu.memory_space<vmem>>) attributes {dimension_semantics = [#tpu.dimension_semantics<parallel>, #tpu.dimension_semantics<arbitrary>], iteration_bounds = array<i64: 1, 1>, scalar_prefetch = 0 : i64, scratch_operands = 2 : i64, tpu.core_type = #tpu.core_type<tc>, window_params = [{transform_indices = @transform_0, window_bounds = array<i64: 16, 32>}, {transform_indices = @transform_1, window_bounds = array<i64: 16, 32>}, {transform_indices = @transform_2, window_bounds = array<i64: 16, 32>}, {transform_indices = @transform_3, window_bounds = array<i64: 16, 32>}, {transform_indices = @transform_4, window_bounds = array<i64: 1, 1, 16>}, {transform_indices = @transform_5, window_bounds = array<i64: 1, 1, 16>}]} {
    %c0_i32 = arith.constant 0 : i32
    %0 = arith.cmpi eq, %arg1, %c0_i32 : i32
    %1 = arith.extui %0 : i1 to i32
    %c0_i32_0 = arith.constant 0 : i32
    %2 = arith.cmpi ne, %1, %c0_i32_0 : i32
    scf.if %2 {
      %cst_30 = arith.constant 0.000000e+00 : f32
      %42 = vector.broadcast %cst_30 : f32 to vector<16x1xf32>
      %c0_31 = arith.constant 0 : index
      %c0_32 = arith.constant 0 : index
      %43 = vector.load %arg8[%c0_31, %c0_32] : memref<16x1xf32, #tpu.memory_space<vmem>>, vector<16x1xf32>
      tpu.vector_store %arg8[%c0_31, %c0_32], %42 {strides = array<i32>} : memref<16x1xf32, #tpu.memory_space<vmem>>, vector<16x1xf32>,
      %cst_33 = arith.constant 0.000000e+00 : f32
      %44 = vector.broadcast %cst_33 : f32 to vector<16x1xf32>
      %c0_34 = arith.constant 0 : index
      %c0_35 = arith.constant 0 : index
      %45 = vector.load %arg9[%c0_34, %c0_35] : memref<16x1xf32, #tpu.memory_space<vmem>>, vector<16x1xf32>
      tpu.vector_store %arg9[%c0_34, %c0_35], %44 {strides = array<i32>} : memref<16x1xf32, #tpu.memory_space<vmem>>, vector<16x1xf32>,
    } else {
    }
    %c0 = arith.constant 0 : index
    %c0_1 = arith.constant 0 : index
    %3 = vector.load %arg2[%c0, %c0_1] : memref<16x32xf32, #tpu.memory_space<vmem>>, vector<16x32xf32>
    %c0_2 = arith.constant 0 : index
    %c0_3 = arith.constant 0 : index
    %4 = vector.load %arg3[%c0_2, %c0_3] : memref<16x32xf32, #tpu.memory_space<vmem>>, vector<16x32xf32>
    %c0_4 = arith.constant 0 : index
    %c0_5 = arith.constant 0 : index
    %5 = vector.load %arg4[%c0_4, %c0_5] : memref<16x32xf32, #tpu.memory_space<vmem>>, vector<16x32xf32>
    %c0_6 = arith.constant 0 : index
    %c0_7 = arith.constant 0 : index
    %6 = vector.load %arg5[%c0_6, %c0_7] : memref<16x32xf32, #tpu.memory_space<vmem>>, vector<16x32xf32>
    %cst = arith.constant dense<0.000000e+00> : vector<16x16xf32>
    %7 = tpu.matmul %3, %5, %cst {dimension_numbers = #tpu.dot_dimension_numbers<[1], [1], [0], [0], [0, 0, 1, 0], [], []>} : vector<16x32xf32>, vector<16x32xf32>, vector<16x16xf32> -> vector<16x16xf32>
    %cst_8 = arith.constant 2.000000e+00 : f32
    %8 = vector.broadcast %cst_8 : f32 to vector<16x16xf32>
    %9 = arith.mulf %7, %8 : vector<16x16xf32>
    %10 = math.exp %9 : vector<16x16xf32>
    %cst_9 = arith.constant dense<0.000000e+00> : vector<16x16xf32>
    %11 = tpu.matmul %3, %6, %cst_9 {dimension_numbers = #tpu.dot_dimension_numbers<[1], [1], [0], [0], [0, 0, 1, 0], [], []>} : vector<16x32xf32>, vector<16x32xf32>, vector<16x16xf32> -> vector<16x16xf32>
    %cst_10 = arith.constant 2.000000e+00 : f32
    %12 = vector.broadcast %cst_10 : f32 to vector<16x16xf32>
    %13 = arith.mulf %11, %12 : vector<16x16xf32>
    %14 = math.exp %13 : vector<16x16xf32>
    %cst_11 = arith.constant dense<0.000000e+00> : vector<16x16xf32>
    %15 = tpu.matmul %4, %5, %cst_11 {dimension_numbers = #tpu.dot_dimension_numbers<[1], [1], [0], [0], [0, 0, 1, 0], [], []>} : vector<16x32xf32>, vector<16x32xf32>, vector<16x16xf32> -> vector<16x16xf32>
    %cst_12 = arith.constant 2.000000e+00 : f32
    %16 = vector.broadcast %cst_12 : f32 to vector<16x16xf32>
    %17 = arith.mulf %15, %16 : vector<16x16xf32>
    %18 = math.exp %17 : vector<16x16xf32>
    %cst_13 = arith.constant dense<0.000000e+00> : vector<16x16xf32>
    %19 = tpu.matmul %4, %6, %cst_13 {dimension_numbers = #tpu.dot_dimension_numbers<[1], [1], [0], [0], [0, 0, 1, 0], [], []>} : vector<16x32xf32>, vector<16x32xf32>, vector<16x16xf32> -> vector<16x16xf32>
    %cst_14 = arith.constant 2.000000e+00 : f32
    %20 = vector.broadcast %cst_14 : f32 to vector<16x16xf32>
    %21 = arith.mulf %19, %20 : vector<16x16xf32>
    %22 = math.exp %21 : vector<16x16xf32>
    %c0_15 = arith.constant 0 : index
    %c0_16 = arith.constant 0 : index
    %23 = vector.load %arg8[%c0_15, %c0_16] : memref<16x1xf32, #tpu.memory_space<vmem>>, vector<16x1xf32>
    %cst_17 = arith.constant dense<0.000000e+00> : vector<16xf32>
    %24 = vector.multi_reduction <add>, %10, %cst_17 [1] : vector<16x16xf32> to vector<16xf32>
    %25 = vector.shape_cast %24 : vector<16xf32> to vector<16x1xf32>
    %cst_18 = arith.constant dense<0.000000e+00> : vector<16xf32>
    %26 = vector.multi_reduction <add>, %14, %cst_18 [1] : vector<16x16xf32> to vector<16xf32>
    %27 = vector.shape_cast %26 : vector<16xf32> to vector<16x1xf32>
    %28 = arith.addf %25, %27 : vector<16x1xf32>
    %29 = arith.addf %23, %28 : vector<16x1xf32>
    %c0_19 = arith.constant 0 : index
    %c0_20 = arith.constant 0 : index
    %30 = vector.load %arg8[%c0_19, %c0_20] : memref<16x1xf32, #tpu.memory_space<vmem>>, vector<16x1xf32>
    tpu.vector_store %arg8[%c0_19, %c0_20], %29 {strides = array<i32>} : memref<16x1xf32, #tpu.memory_space<vmem>>, vector<16x1xf32>,
    %c0_21 = arith.constant 0 : index
    %c0_22 = arith.constant 0 : index
    %31 = vector.load %arg9[%c0_21, %c0_22] : memref<16x1xf32, #tpu.memory_space<vmem>>, vector<16x1xf32>
    %cst_23 = arith.constant dense<0.000000e+00> : vector<16xf32>
    %32 = vector.multi_reduction <add>, %18, %cst_23 [1] : vector<16x16xf32> to vector<16xf32>
    %33 = vector.shape_cast %32 : vector<16xf32> to vector<16x1xf32>
    %cst_24 = arith.constant dense<0.000000e+00> : vector<16xf32>
    %34 = vector.multi_reduction <add>, %22, %cst_24 [1] : vector<16x16xf32> to vector<16xf32>
    %35 = vector.shape_cast %34 : vector<16xf32> to vector<16x1xf32>
    %36 = arith.addf %33, %35 : vector<16x1xf32>
    %37 = arith.addf %31, %36 : vector<16x1xf32>
    %c0_25 = arith.constant 0 : index
    %c0_26 = arith.constant 0 : index
    %38 = vector.load %arg9[%c0_25, %c0_26] : memref<16x1xf32, #tpu.memory_space<vmem>>, vector<16x1xf32>
    tpu.vector_store %arg9[%c0_25, %c0_26], %37 {strides = array<i32>} : memref<16x1xf32, #tpu.memory_space<vmem>>, vector<16x1xf32>,
    %c0_i32_27 = arith.constant 0 : i32
    %39 = arith.cmpi eq, %arg1, %c0_i32_27 : i32
    %40 = arith.extui %39 : i1 to i32
    %cst_28 = arith.constant 2.000000e+00 : f32
    %c0_i32_29 = arith.constant 0 : i32
    %41 = arith.cmpi ne, %40, %c0_i32_29 : i32
    scf.if %41 {
      %42 = arith.mulf %3, %3 : vector<16x32xf32>
      %cst_30 = arith.constant dense<0.000000e+00> : vector<16xf32>
      %43 = vector.multi_reduction <add>, %42, %cst_30 [1] : vector<16x32xf32> to vector<16xf32>
      %44 = vector.shape_cast %43 : vector<16xf32> to vector<16x1xf32>
      %45 = vector.broadcast %cst_28 : f32 to vector<16x1xf32>
      %46 = arith.mulf %44, %45 : vector<16x1xf32>
      %47 = math.exp %46 : vector<16x1xf32>
      %48 = arith.mulf %4, %4 : vector<16x32xf32>
      %cst_31 = arith.constant dense<0.000000e+00> : vector<16xf32>
      %49 = vector.multi_reduction <add>, %48, %cst_31 [1] : vector<16x32xf32> to vector<16xf32>
      %50 = vector.shape_cast %49 : vector<16xf32> to vector<16x1xf32>
      %51 = vector.broadcast %cst_28 : f32 to vector<16x1xf32>
      %52 = arith.mulf %50, %51 : vector<16x1xf32>
      %53 = math.exp %52 : vector<16x1xf32>
      %54 = arith.mulf %3, %4 : vector<16x32xf32>
      %cst_32 = arith.constant dense<0.000000e+00> : vector<16xf32>
      %55 = vector.multi_reduction <add>, %54, %cst_32 [1] : vector<16x32xf32> to vector<16xf32>
      %56 = vector.shape_cast %55 : vector<16xf32> to vector<16x1xf32>
      %57 = vector.broadcast %cst_28 : f32 to vector<16x1xf32>
      %58 = arith.mulf %56, %57 : vector<16x1xf32>
      %c0_33 = arith.constant 0 : index
      %c0_34 = arith.constant 0 : index
      %59 = vector.load %arg8[%c0_33, %c0_34] : memref<16x1xf32, #tpu.memory_space<vmem>>, vector<16x1xf32>
      %60 = arith.subf %59, %47 : vector<16x1xf32>
      %61 = math.log %60 : vector<16x1xf32>
      %62 = arith.subf %61, %58 : vector<16x1xf32>
      %c0_35 = arith.constant 0 : index
      %c0_36 = arith.constant 0 : index
      %63 = vector.load %arg9[%c0_35, %c0_36] : memref<16x1xf32, #tpu.memory_space<vmem>>, vector<16x1xf32>
      %64 = arith.subf %63, %53 : vector<16x1xf32>
      %65 = math.log %64 : vector<16x1xf32>
      %66 = arith.subf %65, %58 : vector<16x1xf32>
      %67 = vector.shape_cast %62 : vector<16x1xf32> to vector<1x1x16xf32>
      %c0_37 = arith.constant 0 : index
      %c0_38 = arith.constant 0 : index
      %c0_39 = arith.constant 0 : index
      %68 = vector.load %arg6[%c0_37, %c0_38, %c0_39] : memref<1x1x16xf32, #tpu.memory_space<vmem>>, vector<1x1x16xf32>
      tpu.vector_store %arg6[%c0_37, %c0_38, %c0_39], %67 {strides = array<i32>} : memref<1x1x16xf32, #tpu.memory_space<vmem>>, vector<1x1x16xf32>,
      %69 = vector.shape_cast %66 : vector<16x1xf32> to vector<1x1x16xf32>
      %c0_40 = arith.constant 0 : index
      %c0_41 = arith.constant 0 : index
      %c0_42 = arith.constant 0 : index
      %70 = vector.load %arg7[%c0_40, %c0_41, %c0_42] : memref<1x1x16xf32, #tpu.memory_space<vmem>>, vector<1x1x16xf32>
      tpu.vector_store %arg7[%c0_40, %c0_41, %c0_42], %69 {strides = array<i32>} : memref<1x1x16xf32, #tpu.memory_space<vmem>>, vector<1x1x16xf32>,
    } else {
    }
    return
  }
  func.func @transform_0(%arg0: i32, %arg1: i32) -> (i32, i32) {
    %c0_i32 = arith.constant 0 : i32
    %c0_i32_0 = arith.constant 0 : i32
    return %arg0, %c0_i32 : i32, i32
  }
  func.func @transform_1(%arg0: i32, %arg1: i32) -> (i32, i32) {
    %c0_i32 = arith.constant 0 : i32
    %c0_i32_0 = arith.constant 0 : i32
    return %arg0, %c0_i32 : i32, i32
  }
  func.func @transform_2(%arg0: i32, %arg1: i32) -> (i32, i32) {
    %c0_i32 = arith.constant 0 : i32
    %c0_i32_0 = arith.constant 0 : i32
    return %arg1, %c0_i32 : i32, i32
  }
  func.func @transform_3(%arg0: i32, %arg1: i32) -> (i32, i32) {
    %c0_i32 = arith.constant 0 : i32
    %c0_i32_0 = arith.constant 0 : i32
    return %arg1, %c0_i32 : i32, i32
  }
  func.func @transform_4(%arg0: i32, %arg1: i32) -> (i32, i32, i32) {
    %c0_i32 = arith.constant 0 : i32
    %c0_i32_0 = arith.constant 0 : i32
    %c0_i32_1 = arith.constant 0 : i32
    return %arg0, %c0_i32, %c0_i32_0 : i32, i32, i32
  }
  func.func @transform_5(%arg0: i32, %arg1: i32) -> (i32, i32, i32) {
    %c0_i32 = arith.constant 0 : i32
    %c0_i32_0 = arith.constant 0 : i32
    %c0_i32_1 = arith.constant 0 : i32
    return %arg0, %c0_i32, %c0_i32_0 : i32, i32, i32
  }
}

</mosaic_0001>

<bundles_post_ra>
// kernel: tpu_custom_call.1
= control target key start
LH: loop header
LB: loop body
LE: loop exit
PB: predicated region body
PF: predicated region fallthrough
CT: control target
= control target key end

     0   :  { %11 = vsyncpa [#allocation5], 0  ;;  %s1001_s0 = inlined_call_operand.hbm [shape: f32[16,32], index: 0, kind: input, shape index: {}]   ;;  %s1002_s1 = inlined_call_operand.hbm [shape: f32[16,32], index: 1, kind: input, shape index: {}]   ;;  %s1003_s2 = inlined_call_operand.hbm [shape: f32[16,32], index: 2, kind: input, shape index: {}]   ;;  %s1004_s3 = inlined_call_operand.hbm [shape: f32[16,32], index: 3, kind: input, shape index: {}]   ;;  %s1005_s4 = inlined_call_operand.hbm [shape: f32[1,1,16], index: 4, kind: output, shape index: {0}]   ;;  %s1006_s5 = inlined_call_operand.hbm [shape: f32[1,1,16], index: 5, kind: output, shape index: {1}]  }
   0x1   :  { %12 = vsyncpa [#allocation8], 0 }
   0x2   :  { %13 = vsyncpa [#allocation11], 0 }
   0x3   :  { %14 = vsyncpa [#allocation6], 0 }
   0x4   :  { %15 = vsyncpa [#allocation14], 0  ;;  %s853_s18 = smov [#allocation7]   ;;  %s854_s20 = smov [#allocation4]  }
   0x5   :  { %s33_s19 = sshll.u32 %s853_s18, 4  ;;  %s21_s21 = sshll.u32 %s854_s20, 4  ;;  %s34_s19 = int_to_ptr.vmem [resolvable:$true] %s33_s19  ;;  %s22_s21 = int_to_ptr.vmem [resolvable:$true] %s21_s21 }
   0x6   :  { %s731_s22 = scalar_lea.vmem %s34_s19, 256  ;;  %p736_p1 = scmp.lt.s32.totalorder %s34_s19, %s34_s19 }
   0x7   :  { %p732_p0 = scmp.ne.s32.totalorder %s34_s19, %s731_s22  ;;  %p737_p2 = scmp.lt.s32.totalorder %s731_s22, %s731_s22 }
   0x9   :  { %p738_p3 = por %p737_p2, %p736_p1 }
   0xb   :  { %p739_p4 = pnand %p738_p3, %p732_p0 }
   0xd   :  { %742 = shalt.err (!%p739_p4)
}
   0xe   :  { %s855_s23 = smov 128   ;;  %s856_s24 = smov 8  }
   0xf   :  { %39 = dma.hbm_to_vmem [thread:$0]  %s1002_s1, 256, %s34_s19, [#allocation8], %s855_s23, %s855_s23, %s856_s24  }
  0x10   :  { %s751_s27 = scalar_lea.vmem %s22_s21, 256  ;;  %p756_p6 = scmp.lt.s32.totalorder %s22_s21, %s22_s21 }
  0x11   :  { %p752_p5 = scmp.ne.s32.totalorder %s22_s21, %s751_s27  ;;  %p757_p7 = scmp.lt.s32.totalorder %s751_s27, %s751_s27 }
  0x13   :  { %p758_p8 = por %p757_p7, %p756_p6 }
  0x15   :  { %p759_p9 = pnand %p758_p8, %p752_p5 }
  0x17   :  { %762 = shalt.err (!%p759_p9)
}
  0x18   :  { %27 = dma.hbm_to_vmem [thread:$0]  %s1001_s0, 256, %s22_s21, [#allocation5], %s855_s23, %s855_s23, %s856_s24  }
  0x19   :  { %s857_s30 = smov [#allocation9]   ;;  %s858_s7 = smov [#allocation10]  }
  0x1a   :  { %s45_s6 = sshll.u32 %s857_s30, 4  ;;  %s57_s8 = sshll.u32 %s858_s7, 4  ;;  %s46_s6 = int_to_ptr.vmem [resolvable:$true] %s45_s6  ;;  %s58_s8 = int_to_ptr.vmem [resolvable:$true] %s57_s8 }
  0x1b   :  { %s771_s1 = scalar_lea.vmem %s46_s6, 256  ;;  %p776_p11 = scmp.lt.s32.totalorder %s46_s6, %s46_s6 }
  0x1c   :  { %p772_p10 = scmp.ne.s32.totalorder %s46_s6, %s771_s1  ;;  %p777_p12 = scmp.lt.s32.totalorder %s771_s1, %s771_s1 }
  0x1e   :  { %p778_p13 = por %p777_p12, %p776_p11 }
  0x20   :  { %p779_p0 = pnand %p778_p13, %p772_p10 }
  0x22   :  { %782 = shalt.err (!%p779_p0)
}
  0x23   :  { %51 = dma.hbm_to_vmem [thread:$0]  %s1003_s2, 256, %s46_s6, [#allocation8], %s855_s23, %s855_s23, %s856_s24  }
  0x24   :  { %s791_s0 = scalar_lea.vmem %s58_s8, 256  ;;  %p796_p2 = scmp.lt.s32.totalorder %s58_s8, %s58_s8 }
  0x25   :  { %p792_p1 = scmp.ne.s32.totalorder %s58_s8, %s791_s0  ;;  %p797_p3 = scmp.lt.s32.totalorder %s791_s0, %s791_s0 }
  0x27   :  { %p798_p4 = por %p797_p3, %p796_p2 }
  0x29   :  { %p799_p5 = pnand %p798_p4, %p792_p1 }
  0x2b   :  { %802 = shalt.err (!%p799_p5)
}
  0x2c   :  { %63 = dma.hbm_to_vmem [thread:$0]  %s1004_s3, 256, %s58_s8, [#allocation11], %s855_s23, %s855_s23, %s856_s24  }
  0x2d   :  { %843 = dma.done.wait [#allocation5], 256  }
  0x2e   :  { %844 = vsyncadd [#allocation5], 4294967040 }
  0x2f   :  { %845 = dma.done.wait [#allocation8], 512  }
  0x30   :  { %846 = vsyncadd [#allocation8], 4294966784 }
  0x31   :  { %847 = dma.done.wait [#allocation11], 256  }
  0x32   :  { %848 = vsyncadd [#allocation11], 4294967040  ;;  %vm93_vm0 = vcmask 261120   ;;  %v90_v0 = vld [vmem:[#allocation9 + $0x8] sm:$0xff]  ;;  %v92_v1 = vld [vmem:[#allocation10 + $0x8] sm:$0xff]  ;;  %vm444_vm1 = vcmask 130048  }
  0x33   :  { %v89_v2 = vld [vmem:[#allocation9] sm:$0xff]  ;;  %651 = vmatprep.subr.msk.mxu0 %vm93_vm0, %v90_v0  ;;  %658 = vmatprep.subr.msk.mxu1 %vm93_vm0, %v92_v1  ;;  %v91_v3 = vld [vmem:[#allocation10] sm:$0xff]  ;;  %v931_v5 = vld [vmem:[#allocation4 + $0x8] sm:$0xff]  ;;  %vm80_vm2 = vcmask 7168   ;;  %v859_v52 = vmov 0.0   ;;  %v860_v61 = vmov 0  }
  0x34   :  { %v919_v4 = vld [vmem:[#allocation4] sm:$0xff]  ;;  %652 = vmatpush3.xpose.msk.msra.mxu0 %vm93_vm0, %v90_v0  ;;  %659 = vmatpush3.xpose.msk.msra.mxu1 %vm93_vm0, %v92_v1  ;;  %v939_v6 = vld [vmem:[#allocation7] sm:$0xff]  ;;  %v951_v7 = vld [vmem:[#allocation7 + $0x8] sm:$0xff]  ;;  %v488_v14 = vmul.f32 %v931_v5, %v931_v5  ;;  %82 = vst.msk [vmem:[#allocation2 + $0x8] sm:$0xff] %vm80_vm2, %v859_v52  ;;  %s861_s2 = smov [#allocation12]   ;;  %vm564_vm3 = vcmask 130112  }
  0x35   :  { %653 = vmatprep.subr.msk.mxu0 %vm93_vm0, %v89_v2  ;;  %660 = vmatprep.subr.msk.mxu1 %vm93_vm0, %v91_v3  ;;  %v501_v8 = vmul.f32 %v939_v6, %v939_v6  ;;  %v487_v10 = vmul.f32 %v919_v4, %v919_v4  ;;  %v502_v12 = vmul.f32 %v951_v7, %v951_v7  ;;  %s594_s3 = sshll.u32 %s861_s2, 4  ;;  %vm567_vm4 = vcmask 122880   ;;  %s595_s3 = int_to_ptr.vmem [resolvable:$true] %s594_s3 }
  0x36   :  { %655 = vmatprep.mubr.msk.f32.mxu0 %vm93_vm0, %v919_v4  ;;  %662 = vmatprep.mubr.msk.f32.mxu1 %vm93_vm0, %v919_v4  ;;  %v492_v15 = vsel %vm93_vm0, %v488_v14, 0.0  ;;  %81 = vst.msk [vmem:[#allocation2] sm:$0xff] %vm80_vm2, %v859_v52  ;;  %83 = vst.msk [vmem:[#allocation3] sm:$0xff] %vm80_vm2, %v859_v52  ;;  %v516_v55 = vmul.f32 %v951_v7, %v931_v5  ;;  %v515_v57 = vmul.f32 %v939_v6, %v919_v4  ;;  %s803_s13 = scalar_lea.vmem %s595_s3, 16  ;;  %s807_s14 = scalar_lea.vmem %s595_s3, 32 }
  0x37   :  { %v503_v9 = vsel %vm93_vm0, %v501_v8, 0.0  ;;  %v489_v11 = vsel %vm93_vm0, %v487_v10, 0.0  ;;  %v506_v13 = vsel %vm93_vm0, %v502_v12, 0.0  ;;  %84 = vst.msk [vmem:[#allocation3 + $0x8] sm:$0xff] %vm80_vm2, %v859_v52  ;;  %690 = vset.pattern.permute.xlu1 %v860_v61  ;;  %689 = vset.pattern.permute.xlu0 %v860_v61  ;;  %p804_p6 = scmp.ne.s32.totalorder %s595_s3, %s803_s13  ;;  %p808_p7 = scmp.lt.s32.totalorder %s595_s3, %s595_s3 }
  0x38   :  { %654 = vmatpush3.xpose.msk.msra.mxu0 %vm93_vm0, %v89_v2  ;;  %661 = vmatpush3.xpose.msk.msra.mxu1 %vm93_vm0, %v91_v3  ;;  %v520_v59 = vsel %vm93_vm0, %v516_v55, 0.0  ;;  %v517_v60 = vsel %vm93_vm0, %v515_v57, 0.0  ;;  %p809_p8 = scmp.lt.s32.totalorder %s807_s14, %s803_s13 }
  0x39   :  { %665 = vmatprep.subr.msk.mxu0 %vm93_vm0, %v90_v0  ;;  %672 = vmatprep.subr.msk.mxu1 %vm93_vm0, %v92_v1 }
  0x3a   :  { %504 = vadd.xlane.f32.xlu1 %v503_v9  ;;  %490 = vadd.xlane.f32.xlu0 %v489_v11  ;;  %p810_p9 = por %p809_p8, %p808_p7 }
  0x3b   :  { %656 = vmatmul.mubr.msk.f32.vlgmr.msra.gmra.mxu0 %vm93_vm0, %v931_v5  ;;  %663 = vmatmul.mubr.msk.f32.vlgmr.msra.gmra.mxu1 %vm93_vm0, %v931_v5  ;;  %v443_v10 = vld [vmem:[#allocation2 + $0x8] sm:$0xff] }
  0x3c   :  { %666 = vmatpush3.xpose.msk.msra.mxu0 %vm93_vm0, %v90_v0  ;;  %673 = vmatpush3.xpose.msk.msra.mxu1 %vm93_vm0, %v92_v1  ;;  %p811_p10 = pnand %p810_p9, %p804_p6 }
  0x3d   :  { %667 = vmatprep.subr.msk.mxu0 %vm93_vm0, %v89_v2  ;;  %674 = vmatprep.subr.msk.mxu1 %vm93_vm0, %v91_v3  ;;  %v442_v14 = vld [vmem:[#allocation2] sm:$0xff] }
  0x3e   :  { %669 = vmatprep.mubr.msk.f32.mxu0 %vm93_vm0, %v939_v6  ;;  %676 = vmatprep.mubr.msk.f32.mxu1 %vm93_vm0, %v939_v6 }
  0x3f   :  { %507 = vadd.xlane.f32.xlu1 %v506_v13  ;;  %493 = vadd.xlane.f32.xlu0 %v492_v15 }
  0x40   :  { %668 = vmatpush3.xpose.msk.msra.mxu0 %vm93_vm0, %v89_v2  ;;  %675 = vmatpush3.xpose.msk.msra.mxu1 %vm93_vm0, %v91_v3 }
  0x43   :  { %670 = vmatmul.mubr.msk.f32.vlgmr.msra.gmra.mxu0 %vm93_vm0, %v951_v7  ;;  %677 = vmatmul.mubr.msk.f32.vlgmr.msra.gmra.mxu1 %vm93_vm0, %v951_v7 }
  0xc3   :  { %v491_v62 = vpop.xlane.xlu0 %490  ;;  %v505_v63 = vpop.xlane.xlu1 %504 }
  0xc4   :  { %v495_v3 = vmul.f32 2.0, %v491_v62  ;;  %v509_v11 = vmul.f32 2.0, %v505_v63 }
  0xc6   :  { %v497_v6 = vmul.f32 1.442695, %v495_v3 }
  0xc8   :  { %v494_v0 = vpop.xlane.xlu0 %493  ;;  %v508_v2 = vpop.xlane.xlu1 %507 }
  0xc9   :  { %v496_v1 = vmul.f32 2.0, %v494_v0  ;;  %v510_v8 = vmul.f32 2.0, %v508_v2 }
  0xcb   :  { %v499_v4 = vmul.f32 1.442695, %v496_v1  ;;  %v513_v15 = vmul.f32 1.442695, %v510_v8 }
  0xfb   :  { %v657_v16 = vpop.f32.mrf.mxu0  ;;  %v664_v17 = vpop.f32.mrf.mxu1 }
  0xfc   :  { %v182_v18 = vmul.f32 2.0, %v657_v16  ;;  %v269_v19 = vmul.f32 2.0, %v664_v17 }
  0xfd   :  { %v172_v20 = vpop.f32.mrf.mxu0  ;;  %v259_v21 = vpop.f32.mrf.mxu1 }
  0xfe   :  { %v185_v22 = vmul.f32 1.442695, %v182_v18  ;;  %v181_v23 = vmul.f32 2.0, %v172_v20  ;;  %v272_v24 = vmul.f32 1.442695, %v269_v19  ;;  %v268_v25 = vmul.f32 2.0, %v259_v21 }
  0xff   :  { %v511_v19 = vmul.f32 1.442695, %v509_v11 }
 0x100   :  { %691 = vpow2.f32 %v185_v22  ;;  %v183_v26 = vmul.f32 1.442695, %v181_v23  ;;  %v270_v27 = vmul.f32 1.442695, %v268_v25  ;;  %v465_v23 = vld [vmem:[#allocation3 + $0x8] sm:$0xff] }
 0x101   :  { %693 = vpow2.f32 %v272_v24 }
 0x102   :  { %695 = vpow2.f32 %v183_v26 }
 0x103   :  { %v671_v28 = vpop.f32.mrf.mxu0  ;;  %v678_v29 = vpop.f32.mrf.mxu1  ;;  %697 = vpow2.f32 %v270_v27  ;;  %v464_v27 = vld [vmem:[#allocation3] sm:$0xff] }
 0x104   :  { %v356_v30 = vmul.f32 2.0, %v671_v28  ;;  %v437_v31 = vmul.f32 2.0, %v678_v29 }
 0x105   :  { %v346_v32 = vpop.f32.mrf.mxu0  ;;  %v427_v33 = vpop.f32.mrf.mxu1 }
 0x106   :  { %v359_v34 = vmul.f32 1.442695, %v356_v30  ;;  %v355_v35 = vmul.f32 2.0, %v346_v32  ;;  %v440_v36 = vmul.f32 1.442695, %v437_v31  ;;  %v436_v37 = vmul.f32 2.0, %v427_v33 }
 0x108   :  { %699 = vpow2.f32 %v359_v34  ;;  %v357_v38 = vmul.f32 1.442695, %v355_v35  ;;  %v438_v39 = vmul.f32 1.442695, %v436_v37 }
 0x109   :  { %701 = vpow2.f32 %v440_v36 }
 0x10a   :  { %703 = vpow2.f32 %v357_v38 }
 0x10b   :  { %705 = vpow2.f32 %v438_v39 }
 0x10c   :  { %707 = vpow2.f32 %v499_v4 }
 0x10d   :  { %v692_v40 = vpop.eup %691  ;;  %709 = vpow2.f32 %v497_v6 }
 0x10e   :  { %v694_v41 = vpop.eup %693  ;;  %v448_v42 = vsel %vm444_vm1, %v692_v40, 0.0  ;;  %711 = vpow2.f32 %v513_v15 }
 0x10f   :  { %v696_v43 = vpop.eup %695  ;;  %449 = vadd.xlane.f32.xlu1 %v448_v42  ;;  %v454_v45 = vsel %vm444_vm1, %v694_v41, 0.0  ;;  %713 = vpow2.f32 %v511_v19 }
 0x110   :  { %v445_v44 = vsel %vm444_vm1, %v696_v43, 0.0  ;;  %v698_v46 = vpop.eup %697 }
 0x111   :  { %446 = vadd.xlane.f32.xlu0 %v445_v44  ;;  %v451_v47 = vsel %vm444_vm1, %v698_v46, 0.0 }
 0x113   :  { %455 = vadd.xlane.f32.xlu1 %v454_v45 }
 0x115   :  { %v700_v48 = vpop.eup %699  ;;  %452 = vadd.xlane.f32.xlu0 %v451_v47 }
 0x116   :  { %v702_v49 = vpop.eup %701  ;;  %v469_v50 = vsel %vm444_vm1, %v700_v48, 0.0 }
 0x117   :  { %v704_v51 = vpop.eup %703  ;;  %470 = vadd.xlane.f32.xlu1 %v469_v50  ;;  %v475_v54 = vsel %vm444_vm1, %v702_v49, 0.0 }
 0x118   :  { %v466_v53 = vsel %vm444_vm1, %v704_v51, 0.0  ;;  %v706_v56 = vpop.eup %705 }
 0x119   :  { %467 = vadd.xlane.f32.xlu0 %v466_v53  ;;  %v472_v58 = vsel %vm444_vm1, %v706_v56, 0.0  ;;  %v708_v25 = vpop.eup %707 }
 0x11a   :  { %v710_v33 = vpop.eup %709 }
 0x11b   :  { %476 = vadd.xlane.f32.xlu1 %v475_v54  ;;  %v712_v36 = vpop.eup %711 }
 0x11c   :  { %v714_v39 = vpop.eup %713 }
 0x11d   :  { %473 = vadd.xlane.f32.xlu0 %v472_v58  ;;  %v553_v58 = vlaneseq }
 0x11f   :  { %521 = vadd.xlane.f32.xlu1 %v520_v59  ;;  %v554_v59 = vand.u32 127, %v553_v58 }
 0x121   :  { %518 = vadd.xlane.f32.xlu0 %v517_v60  ;;  %v556_v60 = vshrl.u32 %v553_v58, 7  ;;  %v559_v61 = vadd.s32 4294967288, %v554_v59 }
 0x123   :  { %v562_v62 = vsub.s32 %v559_v61, %v556_v60  ;;  %v557_v63 = vsub.s32 %v554_v59, %v556_v60 }
 0x198   :  { %v450_v5 = vpop.xlane.xlu1 %449 }
 0x19a   :  { %v447_v7 = vpop.xlane.xlu0 %446 }
 0x19c   :  { %v456_v9 = vpop.xlane.xlu1 %455 }
 0x19d   :  { %v458_v12 = vadd.f32 %v456_v9, %v450_v5 }
 0x19e   :  { %v453_v13 = vpop.xlane.xlu0 %452 }
 0x19f   :  { %v460_v16 = vadd.f32 %v458_v12, %v443_v10  ;;  %v457_v17 = vadd.f32 %v453_v13, %v447_v7 }
 0x1a0   :  { %v471_v18 = vpop.xlane.xlu1 %470 }
 0x1a1   :  { %463 = vst.msk [vmem:[#allocation2 + $0x8] sm:$0xff] %vm80_vm2, %v460_v16  ;;  %v459_v20 = vadd.f32 %v457_v17, %v442_v14 }
 0x1a2   :  { %v468_v21 = vpop.xlane.xlu0 %467 }
 0x1a3   :  { %462 = vst.msk [vmem:[#allocation2] sm:$0xff] %vm80_vm2, %v459_v20 }
 0x1a4   :  { %v477_v22 = vpop.xlane.xlu1 %476 }
 0x1a5   :  { %v479_v24 = vadd.f32 %v477_v22, %v471_v18 }
 0x1a6   :  { %v474_v26 = vpop.xlane.xlu0 %473 }
 0x1a7   :  { %v481_v28 = vadd.f32 %v479_v24, %v465_v23  ;;  %v478_v29 = vadd.f32 %v474_v26, %v468_v21 }
 0x1a8   :  { %v526_v30 = vld [vmem:[#allocation2 + $0x8] sm:$0xff]  ;;  %v522_v42 = vpop.xlane.xlu1 %521 }
 0x1a9   :  { %483 = vst.msk [vmem:[#allocation3 + $0x8] sm:$0xff] %vm80_vm2, %v481_v28  ;;  %v480_v31 = vadd.f32 %v478_v29, %v464_v27  ;;  %v528_v32 = vsub.f32 %v526_v30, %v708_v25  ;;  %v524_v44 = vmul.f32 2.0, %v522_v42 }
 0x1aa   :  { %v525_v34 = vld [vmem:[#allocation2] sm:$0xff]  ;;  %v519_v43 = vpop.xlane.xlu0 %518 }
 0x1ab   :  { %482 = vst.msk [vmem:[#allocation3] sm:$0xff] %vm80_vm2, %v480_v31  ;;  %715 = vlog2.f32 %v528_v32  ;;  %v527_v35 = vsub.f32 %v525_v34, %v710_v33  ;;  %v523_v47 = vmul.f32 2.0, %v519_v43 }
 0x1ad   :  { %717 = vlog2.f32 %v527_v35 }
 0x1b0   :  { %v536_v37 = vld [vmem:[#allocation3 + $0x8] sm:$0xff] }
 0x1b1   :  { %v538_v38 = vsub.f32 %v536_v37, %v712_v36 }
 0x1b2   :  { %v535_v40 = vld [vmem:[#allocation3] sm:$0xff] }
 0x1b3   :  { %v537_v41 = vsub.f32 %v535_v40, %v714_v39  ;;  %719 = vlog2.f32 %v538_v38 }
 0x1b5   :  { %721 = vlog2.f32 %v537_v41 }
 0x1b8   :  { %v716_v45 = vpop.eup %715 }
 0x1b9   :  { %v532_v46 = vmul.f32 0.6931472, %v716_v45 }
 0x1ba   :  { %v718_v48 = vpop.eup %717 }
 0x1bb   :  { %v534_v49 = vsub.f32 %v532_v46, %v524_v44  ;;  %v530_v50 = vmul.f32 0.6931472, %v718_v48 }
 0x1bd   :  { %v533_v51 = vsub.f32 %v530_v50, %v523_v47  ;;  %551 = vperm.xlu1 %690, %v534_v49  }
 0x1bf   :  { %548 = vperm.xlu0 %689, %v533_v51  }
 0x1c0   :  { %v720_v52 = vpop.eup %719 }
 0x1c1   :  { %v542_v55 = vmul.f32 0.6931472, %v720_v52 }
 0x1c2   :  { %v722_v53 = vpop.eup %721 }
 0x1c3   :  { %v540_v54 = vmul.f32 0.6931472, %v722_v53  ;;  %v544_v57 = vsub.f32 %v542_v55, %v524_v44 }
 0x1c5   :  { %v543_v56 = vsub.f32 %v540_v54, %v523_v47 }
 0x1c7   :  { %572 = vperm.xlu1 %690, %v543_v56  }
 0x1cb   :  { %575 = vperm.xlu1 %690, %v544_v57  }
 0x238   :  { %v552_v0 = vpop.permute.xlu1 %551 }
 0x239   :  { %v563_v2 = vrot.slane %v552_v0, %v562_v62 }
 0x23a   :  { %v549_v1 = vpop.permute.xlu0 %548 }
 0x23b   :  { %v558_v3 = vrot.slane %v549_v1, %v557_v63 }
 0x23d   :  { %v565_v4 = vsel %vm564_vm3, %v563_v2, %v558_v3 }
 0x23e   :  { %568 = vst.msk [vmem:[#allocation12] sm:$0x1] %vm567_vm4, %v565_v4 }
 0x23f   :  { %814 = shalt.err (!%p811_p10)
}
 0x240   :  { %597 = dma.vmem_to_hbm [thread:$0]  %s595_s3, 16, %s1005_s4, [#allocation6]  }
 0x241   :  { %s862_s17 = smov [#allocation13]  }
 0x242   :  { %v573_v5 = vpop.permute.xlu1 %572  ;;  %s604_s18 = sshll.u32 %s862_s17, 4  ;;  %s605_s18 = int_to_ptr.vmem [resolvable:$true] %s604_s18 }
 0x243   :  { %v580_v7 = vrot.slane %v573_v5, %v557_v63  ;;  %s823_s19 = scalar_lea.vmem %s605_s18, 16  ;;  %s827_s20 = scalar_lea.vmem %s605_s18, 32 }
 0x244   :  { %p824_p11 = scmp.ne.s32.totalorder %s605_s18, %s823_s19  ;;  %p828_p12 = scmp.lt.s32.totalorder %s605_s18, %s605_s18 }
 0x245   :  { %p829_p13 = scmp.lt.s32.totalorder %s827_s20, %s823_s19 }
 0x246   :  { %v576_v6 = vpop.permute.xlu1 %575 }
 0x247   :  { %v584_v8 = vrot.slane %v576_v6, %v562_v62  ;;  %p830_p0 = por %p829_p13, %p828_p12 }
 0x249   :  { %v585_v9 = vsel %vm564_vm3, %v584_v8, %v580_v7  ;;  %p831_p1 = pnand %p830_p0, %p824_p11 }
 0x24a   :  { %587 = vst.msk [vmem:[#allocation13] sm:$0x1] %vm567_vm4, %v585_v9 }
 0x24b   :  { %834 = shalt.err (!%p831_p1)
}
 0x24c   :  { %607 = dma.vmem_to_hbm [thread:$0]  %s605_s18, 16, %s1006_s5, [#allocation14]  }
 0x24d   :  { %849 = dma.done.wait [#allocation6], 16  }
 0x24e   :  { %850 = vsyncadd [#allocation6], 4294967280 }
 0x24f   :  { %851 = dma.done.wait [#allocation14], 16  }
 0x250   :  { %852 = vsyncadd [#allocation14], 4294967280 }
 0x251   :  { %614 = vsyncpa [#allocation5], 1 }
 0x252   :  { %615 = vsyncpa [#allocation8], 1 }
 0x253   :  { %616 = vsyncpa [#allocation11], 1 }
 0x254   :  { %617 = vsyncpa [#allocation6], 1 }
 0x255   :  { %618 = vsyncpa [#allocation14], 1 }

</bundles_post_ra>
